<compile_context>
chip_gen: v7x
topology: tpu7x:2x2x1
jax: 0.10.0
libtpu: 0.0.40
codegen_flags: <defaults>
</compile_context>

<pallas_src>
import functools

import jax
import jax.numpy as jnp
from jax import lax
from jax.experimental import pallas as pl
from jax.experimental.pallas import tpu as pltpu


def _round_up(x, m):
    return ((x + m - 1) // m) * m


def _patch_embed_kernel(x_ref, w_ref, b_ref, o_ref):
    # x_ref: (tm, Din_p) bf16, w_ref: (E_p, Din_p) bf16, b_ref: (1, E_p) f32,
    # o_ref: (tm, E_p) out dtype.  Contract Din of x against Din of W (axis 1)
    # so the (E, Din) weight layout is consumed directly by the MXU.
    acc = lax.dot_general(
        x_ref[...], w_ref[...],
        dimension_numbers=(((1,), (1,)), ((), ())),
        preferred_element_type=jnp.float32)
    o_ref[...] = (acc + b_ref[...]).astype(o_ref.dtype)


def _choose_tm(M, Din_p, E_p, out_bytes, tm_max=512, budget_bytes=24 << 20):
    """Largest row-tile (multiple of 8, <= tm_max) fitting a conservative VMEM budget.

    Budget = 2x resident (bf16 weight + f32 bias) + double-buffered bf16 x tile
    + double-buffered output tile.  24 MiB keeps us inside the 32 MiB scoped
    default on v6e/v7x (and well inside v7x's 64 MiB physical VMEM).
    """
    resident = 2 * (Din_p * E_p * 2 + E_p * 4)
    tm = min(tm_max, _round_up(M, 8))
    tm = max(8, (tm // 8) * 8)
    while tm > 8:
        per_step = 2 * tm * (Din_p * 2 + E_p * out_bytes)
        if resident + per_step <= budget_bytes:
            break
        tm = max(8, ((tm // 2) // 8) * 8)
    return tm


@functools.partial(jax.jit, static_argnames=("patch_size",))
def patch_embedding_forward(x, weight, bias, patch_size):
    """x: (B, C, H, W) NCHW; weight: (E, C*p*p); bias: (E,). Returns (B, N, E)."""
    B, C, H, W = x.shape
    p = patch_size
    assert H % p == 0 and W % p == 0, \
        "Image dimensions must be divisible by the patch size."
    hp, wp = H // p, W // p
    N = hp * wp
    Din = C * p * p
    E = weight.shape[0]
    out_dtype = x.dtype

    # rearrange 'b c (h p1) (w p2) -> b (h w) (c p1 p2)'  (plain-JAX glue)
    xr = x.reshape(B, C, hp, p, wp, p)
    xr = jnp.transpose(xr, (0, 2, 4, 1, 3, 5))            # (B, hp, wp, C, p, p)
    patches = xr.reshape(B * N, Din)                       # (M, Din)

    M = B * N
    out_bytes = jnp.dtype(out_dtype).itemsize

    # Lane/MXU alignment: pad contraction (Din) and output (E) dims to 128.
    Din_p = _round_up(Din, 128)
    E_p = _round_up(E, 128)

    # Row tiling (pipelined, VMEM-budgeted); pad M up to a multiple of tm.
    tm = _choose_tm(M, Din_p, E_p, out_bytes)
    M_p = _round_up(M, tm)

    # bf16 inputs for the MXU (f32 accumulation inside the kernel), zero-padded.
    x2d = jnp.pad(patches.astype(jnp.bfloat16),
                  ((0, M_p - M), (0, Din_p - Din)))        # (M_p, Din_p)
    w_p = jnp.pad(weight.astype(jnp.bfloat16),
                  ((0, E_p - E), (0, Din_p - Din)))        # (E_p, Din_p)
    b_p = jnp.pad(bias.astype(jnp.float32),
                  (0, E_p - E)).reshape(1, E_p)            # (1, E_p)

    grid = (M_p // tm,)
    # NOTE: for standard ViT sizes the (E_p, Din_p) weight stays resident; no
    # K-tiling axis is added (it would only be needed for very large Din*E).
    out_padded = pl.pallas_call(
        _patch_embed_kernel,
        out_shape=jax.ShapeDtypeStruct((M_p, E_p), out_dtype),
        grid_spec=pltpu.PrefetchScalarGridSpec(
            num_scalar_prefetch=0,
            grid=grid,
            in_specs=[
                pl.BlockSpec((tm, Din_p), lambda i: (i, 0)),   # x tile (pipelined)
                pl.BlockSpec((E_p, Din_p), lambda i: (0, 0)),  # weight (resident)
                pl.BlockSpec((1, E_p), lambda i: (0, 0)),      # bias (resident)
            ],
            out_specs=pl.BlockSpec((tm, E_p), lambda i: (i, 0)),
        ),
        compiler_params=pltpu.CompilerParams(
            dimension_semantics=("parallel",),
            vmem_limit_bytes=32 * 1024 * 1024,
        ),
    )(x2d, w_p, b_p)

    return out_padded[:M, :E].reshape(B, N, E)


if __name__ == "__main__":
    # Small, forward-consistent shapes
    batch, channels, spatial = 2, 4, 16
    patch_size = 4
    embed_dim = 32
    patch_dim = channels * patch_size * patch_size        # 64

    key = jax.random.PRNGKey(0)
    kx, kw, kb = jax.random.split(key, 3)

    x = jax.random.normal(kx, (batch, channels, spatial, spatial), jnp.float32)
    # Deterministic synthetic parameters (nn.Linear(patch_dim, embed_dim) shapes)
    bound = 1.0 / (patch_dim ** 0.5)
    weight = jax.random.uniform(kw, (embed_dim, patch_dim), jnp.float32,
                                minval=-bound, maxval=bound)
    bias = jax.random.uniform(kb, (embed_dim,), jnp.float32,
                              minval=-bound, maxval=bound)

    out = patch_embedding_forward(x, weight, bias, patch_size)
    out = jax.block_until_ready(out)

    # References in plain JAX (same rearrange + linear)
    B, C, H, W = x.shape
    hp, wp = H // patch_size, W // patch_size
    xr = x.reshape(B, C, hp, patch_size, wp, patch_size)
    xr = jnp.transpose(xr, (0, 2, 4, 1, 3, 5)).reshape(B, hp * wp, patch_dim)

    # (a) bf16-rounded reference (matches kernel's MXU precision closely)
    xr_bf = xr.astype(jnp.bfloat16).astype(jnp.float32)
    w_bf = weight.astype(jnp.bfloat16).astype(jnp.float32)
    ref_bf = xr_bf @ w_bf.T + bias
    # (b) full-f32 reference (spec semantics), looser tolerance for bf16 inputs
    ref_f32 = xr @ weight.T + bias

    assert out.shape == (batch, (spatial // patch_size) ** 2, embed_dim)
    assert jnp.allclose(out, ref_bf, atol=2e-3, rtol=2e-3)
    assert jnp.allclose(out, ref_f32, atol=3e-2, rtol=3e-2)

    print("KERNEL_OK")
</pallas_src>

<mosaic_0001>
module attributes {stable_mosaic.version = 11 : i64} {
  func.func @_patch_embed_kernel(%arg0: i32, %arg1: memref<32x128xbf16, #tpu.memory_space<vmem>>, %arg2: memref<128x128xbf16, #tpu.memory_space<vmem>>, %arg3: memref<1x128xf32, #tpu.memory_space<vmem>>, %arg4: memref<32x128xf32, #tpu.memory_space<vmem>>) attributes {dimension_semantics = [#tpu.dimension_semantics<parallel>], iteration_bounds = array<i64: 1>, scalar_prefetch = 0 : i64, scratch_operands = 0 : i64, tpu.core_type = #tpu.core_type<tc>, window_params = [{transform_indices = @transform_0, window_bounds = array<i64: 32, 128>}, {pipeline_mode = #tpu.pipeline_mode<synchronous>, transform_indices = @transform_1, window_bounds = array<i64: 128, 128>}, {pipeline_mode = #tpu.pipeline_mode<synchronous>, transform_indices = @transform_2, window_bounds = array<i64: 1, 128>}, {transform_indices = @transform_3, window_bounds = array<i64: 32, 128>}]} {
    %c0 = arith.constant 0 : index
    %c0_0 = arith.constant 0 : index
    %0 = vector.load %arg1[%c0, %c0_0] : memref<32x128xbf16, #tpu.memory_space<vmem>>, vector<32x128xbf16>
    %c0_1 = arith.constant 0 : index
    %c0_2 = arith.constant 0 : index
    %1 = vector.load %arg2[%c0_1, %c0_2] : memref<128x128xbf16, #tpu.memory_space<vmem>>, vector<128x128xbf16>
    %cst = arith.constant dense<0.000000e+00> : vector<32x128xf32>
    %2 = tpu.matmul %0, %1, %cst {dimension_numbers = #tpu.dot_dimension_numbers<[1], [1], [0], [0], [0, 0, 1, 0], [], []>} : vector<32x128xbf16>, vector<128x128xbf16>, vector<32x128xf32> -> vector<32x128xf32>
    %c0_3 = arith.constant 0 : index
    %c0_4 = arith.constant 0 : index
    %3 = vector.load %arg3[%c0_3, %c0_4] : memref<1x128xf32, #tpu.memory_space<vmem>>, vector<1x128xf32>
    %4 = vector.broadcast %3 : vector<1x128xf32> to vector<32x128xf32>
    %5 = arith.addf %2, %4 : vector<32x128xf32>
    %c0_5 = arith.constant 0 : index
    %c0_6 = arith.constant 0 : index
    %6 = vector.load %arg4[%c0_5, %c0_6] : memref<32x128xf32, #tpu.memory_space<vmem>>, vector<32x128xf32>
    tpu.vector_store %arg4[%c0_5, %c0_6], %5 {strides = array<i32>} : memref<32x128xf32, #tpu.memory_space<vmem>>, vector<32x128xf32>,
    return
  }
  func.func @transform_0(%arg0: i32) -> (i32, i32) {
    %c0_i32 = arith.constant 0 : i32
    %c0_i32_0 = arith.constant 0 : i32
    return %arg0, %c0_i32 : i32, i32
  }
  func.func @transform_1(%arg0: i32) -> (i32, i32) {
    %c0_i32 = arith.constant 0 : i32
    %c0_i32_0 = arith.constant 0 : i32
    %c0_i32_1 = arith.constant 0 : i32
    return %c0_i32, %c0_i32_0 : i32, i32
  }
  func.func @transform_2(%arg0: i32) -> (i32, i32) {
    %c0_i32 = arith.constant 0 : i32
    %c0_i32_0 = arith.constant 0 : i32
    %c0_i32_1 = arith.constant 0 : i32
    return %c0_i32, %c0_i32_0 : i32, i32
  }
  func.func @transform_3(%arg0: i32) -> (i32, i32) {
    %c0_i32 = arith.constant 0 : i32
    %c0_i32_0 = arith.constant 0 : i32
    return %arg0, %c0_i32 : i32, i32
  }
}

</mosaic_0001>

<bundles_post_ra>
// kernel: patch_embedding_forward.1
= control target key start
LH: loop header
LB: loop body
LE: loop exit
PB: predicated region body
PF: predicated region fallthrough
CT: control target
= control target key end

     0   :  { %s318_s0 = inlined_call_operand.vmem [shape: bf16[32,128], index: 0, kind: input, shape index: {}]   ;;  %s319_s1 = inlined_call_operand.vmem [shape: bf16[128,128], index: 1, kind: input, shape index: {}]   ;;  %s320_s2 = inlined_call_operand.vmem [shape: f32[1,128], index: 2, kind: input, shape index: {}]   ;;  %s321_s3 = inlined_call_operand.hbm [shape: f32[32,128], index: 3, kind: output, shape index: {}]  }
   0x1   :  { %v216_v0 = vld [vmem:[%s319_s1] sm:$0xff]   ;;  %v217_v1 = vld [vmem:[%s319_s1 + $0x8] sm:$0xff]   ;;  %v218_v2 = vld [vmem:[%s319_s1 + $0x10] sm:$0xff]  }
   0x2   :  { %193 = vmatprep.subr.bf16.mxu0 %v216_v0  ;;  %v224_v3 = vld [vmem:[%s318_s0] sm:$0xff]  }
   0x3   :  { %194 = vmatpush3.bf16.xpose.msra.mxu0 %v216_v0  ;;  %209 = vmatprep.mubr.bf16.mxu0 %v224_v3 }
   0x4   :  { %195 = vmatprep.subr.bf16.mxu0 %v217_v1 }
   0x5   :  { %8 = vsyncpa [#allocation3], 0  ;;  %v219_v4 = vld [vmem:[%s319_s1 + $0x18] sm:$0xff]   ;;  %v220_v5 = vld [vmem:[%s319_s1 + $0x20] sm:$0xff]   ;;  %s250_s7 = smov [#allocation2]  }
   0x6   :  { %v221_v6 = vld [vmem:[%s319_s1 + $0x28] sm:$0xff]   ;;  %v222_v7 = vld [vmem:[%s319_s1 + $0x30] sm:$0xff]   ;;  %v223_v8 = vld [vmem:[%s319_s1 + $0x38] sm:$0xff]   ;;  %s161_s8 = sshll.u32 %s250_s7, 4  ;;  %s162_s8 = int_to_ptr.vmem [resolvable:$true] %s161_s8 }
   0x7   :  { %v225_v9 = vld [vmem:[%s318_s0 + $0x8] sm:$0xff]   ;;  %v172_v10 = vld [vmem:[%s320_s2] ss:$0 sm:$0xff]  ;;  %s226_s0 = scalar_lea.vmem %s162_s8, 512  ;;  %p231_p1 = scmp.lt.s32.totalorder %s162_s8, %s162_s8 }
   0x8   :  { %p227_p0 = scmp.ne.s32.totalorder %s162_s8, %s226_s0  ;;  %p232_p2 = scmp.lt.s32.totalorder %s226_s0, %s226_s0 }
   0xa   :  { %p233_p3 = por %p232_p2, %p231_p1 }
   0xb   :  { %196 = vmatpush3.bf16.xpose.msra.mxu0 %v217_v1 }
   0xc   :  { %197 = vmatprep.subr.bf16.mxu0 %v218_v2  ;;  %p234_p4 = pnand %p233_p3, %p227_p0 }
  0x13   :  { %198 = vmatpush3.bf16.xpose.msra.mxu0 %v218_v2 }
  0x14   :  { %199 = vmatprep.subr.bf16.mxu0 %v219_v4 }
  0x1b   :  { %200 = vmatpush3.bf16.xpose.msra.mxu0 %v219_v4 }
  0x1c   :  { %201 = vmatprep.subr.bf16.mxu0 %v220_v5 }
  0x23   :  { %202 = vmatpush3.bf16.xpose.msra.mxu0 %v220_v5 }
  0x24   :  { %203 = vmatprep.subr.bf16.mxu0 %v221_v6 }
  0x2b   :  { %204 = vmatpush3.bf16.xpose.msra.mxu0 %v221_v6 }
  0x2c   :  { %205 = vmatprep.subr.bf16.mxu0 %v222_v7 }
  0x33   :  { %206 = vmatpush3.bf16.xpose.msra.mxu0 %v222_v7 }
  0x34   :  { %207 = vmatprep.subr.bf16.mxu0 %v223_v8 }
  0x3b   :  { %208 = vmatpush3.bf16.xpose.msra.mxu0 %v223_v8 }
  0x42   :  { %210 = vmatmul.mubr.bf16.vlgmr.msra.gmra.mrb[0].mxu0 %v225_v9 }
 0x115   :  { %v211_v11 = vpop.f32.mrb[0].mxu0 }
 0x116   :  { %v146_v12 = vadd.f32 %v211_v11, %v172_v10  ;;  %v137_v13 = vpop.f32.mrb[1].mxu0 }
 0x117   :  { %v138_v14 = vadd.f32 %v172_v10, %v137_v13  ;;  %v212_v15 = vpop.f32.mrb[2].mxu0 }
 0x118   :  { %154 = vst [vmem:[#allocation2 + $0x10] sm:$0xff] %v146_v12  ;;  %v149_v16 = vadd.f32 %v212_v15, %v172_v10  ;;  %v140_v17 = vpop.f32.mrb[3].mxu0 }
 0x119   :  { %152 = vst [vmem:[#allocation2] sm:$0xff] %v138_v14  ;;  %v141_v18 = vadd.f32 %v172_v10, %v140_v17 }
 0x11a   :  { %155 = vst [vmem:[#allocation2 + $0x18] sm:$0xff] %v149_v16 }
 0x11b   :  { %153 = vst [vmem:[#allocation2 + $0x8] sm:$0xff] %v141_v18 }
 0x11c   :  { %237 = shalt.err (!%p234_p4)
}
 0x11d   :  { %s238_s9 = scalar_lea.hbm %s321_s3, 512 }
 0x11e   :  { %p239_p5 = scmp.ne.s32.totalorder %s321_s3, %s238_s9  ;;  %p242_p6 = scmp.lt.u32.totalorder %s238_s9, %s321_s3 }
 0x120   :  { %p244_p7 = pnand %p242_p6, %p239_p5 }
 0x122   :  { %247 = shalt.err (!%p244_p7)
}
 0x123   :  { %s251_s14 = smov 128   ;;  %s252_s15 = smov 8  }
 0x124   :  { %167 = dma.vmem_to_hbm [thread:$0]  %s162_s8, 512, %s321_s3, [#allocation3], %s251_s14, %s251_s14, %s252_s15  }
 0x125   :  { %248 = dma.done.wait [#allocation3], 512  }
 0x126   :  { %249 = vsyncadd [#allocation3], 4294966784 }
 0x127   :  { %171 = vsyncpa [#allocation3], 1 }

</bundles_post_ra>
